<compile_context>
chip_gen: v7x
topology: tpu7x:2x2x1
jax: 0.10.0
libtpu: 0.0.40
codegen_flags: <defaults>
</compile_context>

<pallas_src>
import functools

import numpy as np

import jax
import jax.numpy as jnp
from jax.experimental import pallas as pl
from jax.experimental.pallas import tpu as pltpu


def _pick_tile(hwc, target=2048):
    """Largest multiple of 128 that divides hwc (capped), preferring >=2 tiles."""
    if hwc % 128 != 0:
        return hwc                      # fall back to a single full-width tile
    cap = min(target, hwc // 2 if hwc >= 256 else hwc)
    best = 128
    t = 128
    while t <= cap:
        if hwc % t == 0:
            best = t
        t += 128
    return best


def _conv_kernel(x_ref, w_ref, b_ref, m_ref, o_ref, *, offs, off_min, tile,
                 apply_relu):
    """One (batch, spatial-tile) grid step.

    x_ref : (1, 1, Cin, Wwin)   halo-padded flat-HW input window (compute dtype)
    w_ref : (Cout, K)           K = KH*KW*Cin                     (compute dtype)
    b_ref : (Cout, 1)           float32
    m_ref : (KH*KW, T)          per-tap border-validity masks     (compute dtype)
    o_ref : (1, Cout, T)        lane-dense output tile
    """
    taps = []
    for t_idx, off in enumerate(offs):          # static, fully unrolled
        d0 = off - off_min                      # static slice start
        patch = x_ref[0, 0, :, d0:d0 + tile]    # (Cin, T) view load, no relayout
        mask = m_ref[t_idx:t_idx + 1, :]        # (1, T)
        taps.append(patch * mask)               # zero out-of-image contributions
    slab = jnp.concatenate(taps, axis=0)        # (K, T) im2col slab, lane-dense

    # Single MXU matmul, K = KH*KW*Cin, f32 accumulation.
    acc = jnp.dot(w_ref[...], slab, preferred_element_type=jnp.float32)  # (Cout, T)
    acc = acc + b_ref[...]                      # bias, broadcast along lanes
    if apply_relu:
        acc = jnp.maximum(acc, 0.0)
    o_ref[0] = acc.astype(o_ref.dtype)


def basic_conv(x, weight, bias=None, *, stride=1, padding=0, dilation=1,
               groups=1, relu=True, bn_params=None, bn_eps=1e-5, up_size=0,
               compute_dtype=jnp.bfloat16):
    """Forward pass of BasicConv.

    x      : (N, Cin, H, W)       float32, NCHW (kept native)
    weight : (Cout, Cin, KH, KW)  float32, OIHW
    bias   : (Cout,) or None
    bn_params : optional (gamma, beta, mean, var) -> eval-mode BN folded into
                the conv weight/bias.
    compute_dtype : MXU operand dtype (bf16 default; accumulation is f32).
    """
    n, cin, h, w = x.shape
    cout, cin_w, kh, kw = weight.shape
    assert cin_w == cin, (cin_w, cin)
    if groups != 1:
        # TODO(synk): grouped convolution not implemented in the Pallas path.
        raise NotImplementedError("groups != 1 is not supported")
    if bias is None:
        bias = jnp.zeros((cout,), x.dtype)

    # Eval-mode BatchNorm folded into weight/bias (keeps fused bias+ReLU path).
    if bn_params is not None:
        gamma, beta, mean, var = bn_params
        inv = gamma / jnp.sqrt(var + bn_eps)
        weight = weight * inv[:, None, None, None]
        bias = (bias - mean) * inv + beta

    d = dilation
    dkh = d * (kh - 1) + 1
    dkw = d * (kw - 1) + 1
    h1 = h + 2 * padding - dkh + 1              # stride-1 output height
    w1 = w + 2 * padding - dkw + 1              # stride-1 output width
    assert h1 >= 1 and w1 >= 1, "empty output"
    if w1 > w:
        # TODO(synk): over-padded convs (output wider than input) not supported
        # by the uniform-shift formulation.
        raise NotImplementedError("padding wider than 'same' is not supported")

    hwc = h1 * w                                # compute grid: h1 rows of width w

    # Per-tap flat-domain offsets + border-validity masks (static constants).
    offs = []
    masks = []
    rows_i = np.arange(h1)
    cols_j = np.arange(w)
    for ih in range(kh):
        for iw in range(kw):
            offs.append((ih * d - padding) * w + (iw * d - padding))
            r_in = rows_i + ih * d - padding
            c_in = cols_j + iw * d - padding
            m = (((r_in >= 0) & (r_in < h))[:, None]
                 & ((c_in >= 0) & (c_in < w))[None, :])
            masks.append(m.reshape(-1))
    off_min, off_max = min(offs), max(offs)
    mask_arr = jnp.asarray(np.stack(masks), dtype=compute_dtype)   # (ntaps, hwc)

    # Spatial tiling over the flat compute axis (lane-dense tiles).
    t = _pick_tile(hwc)
    assert hwc % t == 0
    n_tiles = hwc // t
    wwin = t + (off_max - off_min)              # per-tile halo'd window width

    # Flatten + halo-pad the input in the flat HW domain; window-stack per tile
    # so every in-kernel tap slice is static.  (No NCHW<->NHWC transposes.)
    pad_lo = max(0, -off_min)
    pad_hi = max(0, (hwc - 1) + off_max - (h * w - 1))
    x_flat = x.reshape(n, cin, h * w).astype(compute_dtype)
    x_flat = jnp.pad(x_flat, ((0, 0), (0, 0), (pad_lo, pad_hi)))
    x_win = jnp.stack(
        [x_flat[:, :, ti * t: ti * t + wwin] for ti in range(n_tiles)],
        axis=1)                                 # (N, n_tiles, Cin, Wwin)

    # Weight as a single (Cout, K) matrix, K index = (kh*KW + kw)*Cin + cin.
    w2 = (jnp.transpose(weight, (0, 2, 3, 1))
          .reshape(cout, kh * kw * cin).astype(compute_dtype))
    b2 = bias.reshape(cout, 1).astype(jnp.float32)

    # Explicit VMEM budget with headroom (blocks are image-size independent,
    # well inside v7x's 64 MiB physical VMEM).
    cbytes = np.dtype(compute_dtype).itemsize
    block_bytes = (cin * wwin * cbytes                      # input window
                   + kh * kw * t * cbytes                   # mask tile
                   + cout * t * x.dtype.itemsize            # output tile
                   + cout * kh * kw * cin * cbytes          # weight
                   + cout * 4)                              # bias
    vmem_limit = int(min(32 * 1024 * 1024, max(8 * 1024 * 1024, 8 * block_bytes)))

    kernel = functools.partial(_conv_kernel, offs=tuple(offs), off_min=off_min,
                               tile=t, apply_relu=relu)

    out_flat = pl.pallas_call(
        kernel,
        out_shape=jax.ShapeDtypeStruct((n, cout, hwc), x.dtype),
        grid_spec=pltpu.PrefetchScalarGridSpec(
            num_scalar_prefetch=0,
            grid=(n, n_tiles),
            in_specs=[
                # halo'd input window: one per (batch, spatial tile)
                pl.BlockSpec((1, 1, cin, wwin), lambda nb, tb: (nb, tb, 0, 0)),
                # weight / bias: constant across the grid -> single-buffered
                pl.BlockSpec((cout, kh * kw * cin), lambda nb, tb: (0, 0),
                             pipeline_mode=pl.Buffered(1)),
                pl.BlockSpec((cout, 1), lambda nb, tb: (0, 0),
                             pipeline_mode=pl.Buffered(1)),
                # per-tap masks, tiled along the flat spatial axis
                pl.BlockSpec((kh * kw, t), lambda nb, tb: (0, tb)),
            ],
            out_specs=pl.BlockSpec((1, cout, t), lambda nb, tb: (nb, 0, tb)),
        ),
        compiler_params=pltpu.CompilerParams(
            dimension_semantics=("parallel", "parallel"),
            vmem_limit_bytes=vmem_limit),
    )(x_win, w2, b2, mask_arr)

    # Free reshape back to NCHW spatial; trim compute-only columns; apply stride.
    y = out_flat.reshape(n, cout, h1, w)
    if w1 < w:
        y = y[:, :, :, :w1]
    if stride > 1:
        y = y[:, :, ::stride, ::stride]

    if up_size > 0:
        # TODO(synk): bilinear resize kept as plain JAX glue (gather/lerp, no
        # matmul hot path); antialias=False matches F.interpolate("bilinear").
        y = jax.image.resize(y, (n, cout, up_size, up_size), method="bilinear",
                             antialias=False)
    return y


if __name__ == "__main__":
    key = jax.random.PRNGKey(0)
    k_x, k_w, k_b, k_g, k_be, k_m, k_v = jax.random.split(key, 7)

    # BasicConv(in_planes=4, out_planes=8, kernel_size=3, stride=1, padding=1)
    N, CIN, H, W = 2, 4, 16, 16
    COUT, KH, KW = 8, 3, 3

    x = jax.random.normal(k_x, (N, CIN, H, W), jnp.float32)
    weight = jax.random.normal(k_w, (COUT, CIN, KH, KW), jnp.float32) * 0.1
    bias = jax.random.normal(k_b, (COUT,), jnp.float32) * 0.1

    def conv_ref(xx, ww, stride=1, padding=1):
        return jax.lax.conv_general_dilated(
            xx, ww, window_strides=(stride, stride),
            padding=[(padding, padding), (padding, padding)],
            dimension_numbers=("NCHW", "OIHW", "NCHW"),
            precision=jax.lax.Precision.HIGHEST)

    # 1) exact path (f32 MXU operands) vs XLA conv.
    out_f32 = jax.block_until_ready(
        basic_conv(x, weight, bias, stride=1, padding=1, relu=True,
                   compute_dtype=jnp.float32))
    ref1 = jnp.maximum(conv_ref(x, weight) + bias[None, :, None, None], 0.0)
    assert out_f32.shape == (N, COUT, H, W), out_f32.shape
    assert jnp.allclose(out_f32, ref1, atol=2e-4, rtol=2e-4), \
        float(jnp.max(jnp.abs(out_f32 - ref1)))

    # 2) default fast path (bf16 MXU operands, f32 accumulation) vs a reference
    #    computed on bf16-rounded inputs.
    out_bf = jax.block_until_ready(
        basic_conv(x, weight, bias, stride=1, padding=1, relu=True))
    xr = x.astype(jnp.bfloat16).astype(jnp.float32)
    wr = weight.astype(jnp.bfloat16).astype(jnp.float32)
    ref2 = jnp.maximum(conv_ref(xr, wr) + bias[None, :, None, None], 0.0)
    assert jnp.allclose(out_bf, ref2, atol=2e-3, rtol=2e-3), \
        float(jnp.max(jnp.abs(out_bf - ref2)))

    # 3) stride=2 path.
    out_s2 = jax.block_until_ready(
        basic_conv(x, weight, bias, stride=2, padding=1, relu=True,
                   compute_dtype=jnp.float32))
    ref3 = jnp.maximum(conv_ref(x, weight, stride=2) + bias[None, :, None, None],
                       0.0)
    assert out_s2.shape == ref3.shape == (N, COUT, 8, 8), out_s2.shape
    assert jnp.allclose(out_s2, ref3, atol=2e-4, rtol=2e-4), \
        float(jnp.max(jnp.abs(out_s2 - ref3)))

    # 4) BN folding + bilinear upsample path.
    gamma = 1.0 + 0.1 * jax.random.normal(k_g, (COUT,), jnp.float32)
    beta = 0.1 * jax.random.normal(k_be, (COUT,), jnp.float32)
    mean = 0.1 * jax.random.normal(k_m, (COUT,), jnp.float32)
    var = jnp.abs(jax.random.normal(k_v, (COUT,), jnp.float32)) + 0.5
    out_bn = jax.block_until_ready(
        basic_conv(x, weight, bias, stride=1, padding=1, relu=True,
                   bn_params=(gamma, beta, mean, var), up_size=32,
                   compute_dtype=jnp.float32))
    z = conv_ref(x, weight) + bias[None, :, None, None]
    z = ((z - mean[None, :, None, None])
         / jnp.sqrt(var[None, :, None, None] + 1e-5)
         * gamma[None, :, None, None] + beta[None, :, None, None])
    z = jnp.maximum(z, 0.0)
    ref4 = jax.image.resize(z, (N, COUT, 32, 32), method="bilinear",
                            antialias=False)
    assert out_bn.shape == (N, COUT, 32, 32), out_bn.shape
    assert jnp.allclose(out_bn, ref4, atol=2e-4, rtol=2e-4), \
        float(jnp.max(jnp.abs(out_bn - ref4)))

    print("KERNEL_OK")
</pallas_src>

<mosaic_0001>
module attributes {stable_mosaic.version = 11 : i64} {
  func.func @_conv_kernel(%arg0: i32, %arg1: i32, %arg2: memref<1x1x4x162xf32, #tpu.memory_space<vmem>>, %arg3: memref<8x36xf32, #tpu.memory_space<vmem>>, %arg4: memref<8x1xf32, #tpu.memory_space<vmem>>, %arg5: memref<9x128xf32, #tpu.memory_space<vmem>>, %arg6: memref<1x8x128xf32, #tpu.memory_space<vmem>>) attributes {dimension_semantics = [#tpu.dimension_semantics<parallel>, #tpu.dimension_semantics<parallel>], iteration_bounds = array<i64: 2, 2>, scalar_prefetch = 0 : i64, scratch_operands = 0 : i64, tpu.core_type = #tpu.core_type<tc>, window_params = [{transform_indices = @transform_0, window_bounds = array<i64: 1, 1, 4, 162>}, {pipeline_mode = #tpu.pipeline_mode<synchronous>, transform_indices = @transform_1, window_bounds = array<i64: 8, 36>}, {pipeline_mode = #tpu.pipeline_mode<synchronous>, transform_indices = @transform_2, window_bounds = array<i64: 8, 1>}, {transform_indices = @transform_3, window_bounds = array<i64: 9, 128>}, {transform_indices = @transform_4, window_bounds = array<i64: 1, 8, 128>}]} {
    %c0 = arith.constant 0 : index
    %c0_0 = arith.constant 0 : index
    %c0_1 = arith.constant 0 : index
    %c0_2 = arith.constant 0 : index
    %0 = vector.load %arg2[%c0, %c0_0, %c0_1, %c0_2] : memref<1x1x4x162xf32, #tpu.memory_space<vmem>>, vector<1x1x4x128xf32>
    %1 = vector.shape_cast %0 : vector<1x1x4x128xf32> to vector<4x128xf32>
    %c0_3 = arith.constant 0 : index
    %c0_4 = arith.constant 0 : index
    %2 = vector.load %arg5[%c0_3, %c0_4] : memref<9x128xf32, #tpu.memory_space<vmem>>, vector<1x128xf32>
    %3 = vector.broadcast %2 : vector<1x128xf32> to vector<4x128xf32>
    %4 = arith.mulf %1, %3 : vector<4x128xf32>
    %c0_5 = arith.constant 0 : index
    %c0_6 = arith.constant 0 : index
    %c0_7 = arith.constant 0 : index
    %c1 = arith.constant 1 : index
    %5 = vector.load %arg2[%c0_5, %c0_6, %c0_7, %c1] : memref<1x1x4x162xf32, #tpu.memory_space<vmem>>, vector<1x1x4x128xf32>
    %6 = vector.shape_cast %5 : vector<1x1x4x128xf32> to vector<4x128xf32>
    %c1_8 = arith.constant 1 : index
    %c0_9 = arith.constant 0 : index
    %7 = vector.load %arg5[%c1_8, %c0_9] : memref<9x128xf32, #tpu.memory_space<vmem>>, vector<1x128xf32>
    %8 = vector.broadcast %7 : vector<1x128xf32> to vector<4x128xf32>
    %9 = arith.mulf %6, %8 : vector<4x128xf32>
    %c0_10 = arith.constant 0 : index
    %c0_11 = arith.constant 0 : index
    %c0_12 = arith.constant 0 : index
    %c2 = arith.constant 2 : index
    %10 = vector.load %arg2[%c0_10, %c0_11, %c0_12, %c2] : memref<1x1x4x162xf32, #tpu.memory_space<vmem>>, vector<1x1x4x128xf32>
    %11 = vector.shape_cast %10 : vector<1x1x4x128xf32> to vector<4x128xf32>
    %c2_13 = arith.constant 2 : index
    %c0_14 = arith.constant 0 : index
    %12 = vector.load %arg5[%c2_13, %c0_14] : memref<9x128xf32, #tpu.memory_space<vmem>>, vector<1x128xf32>
    %13 = vector.broadcast %12 : vector<1x128xf32> to vector<4x128xf32>
    %14 = arith.mulf %11, %13 : vector<4x128xf32>
    %c0_15 = arith.constant 0 : index
    %c0_16 = arith.constant 0 : index
    %c0_17 = arith.constant 0 : index
    %c16 = arith.constant 16 : index
    %15 = vector.load %arg2[%c0_15, %c0_16, %c0_17, %c16] : memref<1x1x4x162xf32, #tpu.memory_space<vmem>>, vector<1x1x4x128xf32>
    %16 = vector.shape_cast %15 : vector<1x1x4x128xf32> to vector<4x128xf32>
    %c3 = arith.constant 3 : index
    %c0_18 = arith.constant 0 : index
    %17 = vector.load %arg5[%c3, %c0_18] : memref<9x128xf32, #tpu.memory_space<vmem>>, vector<1x128xf32>
    %18 = vector.broadcast %17 : vector<1x128xf32> to vector<4x128xf32>
    %19 = arith.mulf %16, %18 : vector<4x128xf32>
    %c0_19 = arith.constant 0 : index
    %c0_20 = arith.constant 0 : index
    %c0_21 = arith.constant 0 : index
    %c17 = arith.constant 17 : index
    %20 = vector.load %arg2[%c0_19, %c0_20, %c0_21, %c17] : memref<1x1x4x162xf32, #tpu.memory_space<vmem>>, vector<1x1x4x128xf32>
    %21 = vector.shape_cast %20 : vector<1x1x4x128xf32> to vector<4x128xf32>
    %c4 = arith.constant 4 : index
    %c0_22 = arith.constant 0 : index
    %22 = vector.load %arg5[%c4, %c0_22] : memref<9x128xf32, #tpu.memory_space<vmem>>, vector<1x128xf32>
    %23 = vector.broadcast %22 : vector<1x128xf32> to vector<4x128xf32>
    %24 = arith.mulf %21, %23 : vector<4x128xf32>
    %c0_23 = arith.constant 0 : index
    %c0_24 = arith.constant 0 : index
    %c0_25 = arith.constant 0 : index
    %c18 = arith.constant 18 : index
    %25 = vector.load %arg2[%c0_23, %c0_24, %c0_25, %c18] : memref<1x1x4x162xf32, #tpu.memory_space<vmem>>, vector<1x1x4x128xf32>
    %26 = vector.shape_cast %25 : vector<1x1x4x128xf32> to vector<4x128xf32>
    %c5 = arith.constant 5 : index
    %c0_26 = arith.constant 0 : index
    %27 = vector.load %arg5[%c5, %c0_26] : memref<9x128xf32, #tpu.memory_space<vmem>>, vector<1x128xf32>
    %28 = vector.broadcast %27 : vector<1x128xf32> to vector<4x128xf32>
    %29 = arith.mulf %26, %28 : vector<4x128xf32>
    %c0_27 = arith.constant 0 : index
    %c0_28 = arith.constant 0 : index
    %c0_29 = arith.constant 0 : index
    %c32 = arith.constant 32 : index
    %30 = vector.load %arg2[%c0_27, %c0_28, %c0_29, %c32] : memref<1x1x4x162xf32, #tpu.memory_space<vmem>>, vector<1x1x4x128xf32>
    %31 = vector.shape_cast %30 : vector<1x1x4x128xf32> to vector<4x128xf32>
    %c6 = arith.constant 6 : index
    %c0_30 = arith.constant 0 : index
    %32 = vector.load %arg5[%c6, %c0_30] : memref<9x128xf32, #tpu.memory_space<vmem>>, vector<1x128xf32>
    %33 = vector.broadcast %32 : vector<1x128xf32> to vector<4x128xf32>
    %34 = arith.mulf %31, %33 : vector<4x128xf32>
    %c0_31 = arith.constant 0 : index
    %c0_32 = arith.constant 0 : index
    %c0_33 = arith.constant 0 : index
    %c33 = arith.constant 33 : index
    %35 = vector.load %arg2[%c0_31, %c0_32, %c0_33, %c33] : memref<1x1x4x162xf32, #tpu.memory_space<vmem>>, vector<1x1x4x128xf32>
    %36 = vector.shape_cast %35 : vector<1x1x4x128xf32> to vector<4x128xf32>
    %c7 = arith.constant 7 : index
    %c0_34 = arith.constant 0 : index
    %37 = vector.load %arg5[%c7, %c0_34] : memref<9x128xf32, #tpu.memory_space<vmem>>, vector<1x128xf32>
    %38 = vector.broadcast %37 : vector<1x128xf32> to vector<4x128xf32>
    %39 = arith.mulf %36, %38 : vector<4x128xf32>
    %c0_35 = arith.constant 0 : index
    %c0_36 = arith.constant 0 : index
    %c0_37 = arith.constant 0 : index
    %c34 = arith.constant 34 : index
    %40 = vector.load %arg2[%c0_35, %c0_36, %c0_37, %c34] : memref<1x1x4x162xf32, #tpu.memory_space<vmem>>, vector<1x1x4x128xf32>
    %41 = vector.shape_cast %40 : vector<1x1x4x128xf32> to vector<4x128xf32>
    %c8 = arith.constant 8 : index
    %c0_38 = arith.constant 0 : index
    %42 = vector.load %arg5[%c8, %c0_38] : memref<9x128xf32, #tpu.memory_space<vmem>>, vector<1x128xf32>
    %43 = vector.broadcast %42 : vector<1x128xf32> to vector<4x128xf32>
    %44 = arith.mulf %41, %43 : vector<4x128xf32>
    %45 = tpu.concatenate %4, %9, %14, %19, %24, %29, %34, %39, %44 in 0 : vector<4x128xf32>, vector<4x128xf32>, vector<4x128xf32>, vector<4x128xf32>, vector<4x128xf32>, vector<4x128xf32>, vector<4x128xf32>, vector<4x128xf32>, vector<4x128xf32> -> vector<36x128xf32>
    %c0_39 = arith.constant 0 : index
    %c0_40 = arith.constant 0 : index
    %46 = vector.load %arg3[%c0_39, %c0_40] : memref<8x36xf32, #tpu.memory_space<vmem>>, vector<8x36xf32>
    %cst = arith.constant dense<0.000000e+00> : vector<8x128xf32>
    %47 = tpu.matmul %46, %45, %cst {dimension_numbers = #tpu.dot_dimension_numbers<[1], [0], [0], [1], [0, 0, 1, 1], [], []>} : vector<8x36xf32>, vector<36x128xf32>, vector<8x128xf32> -> vector<8x128xf32>
    %c0_41 = arith.constant 0 : index
    %c0_42 = arith.constant 0 : index
    %48 = vector.load %arg4[%c0_41, %c0_42] : memref<8x1xf32, #tpu.memory_space<vmem>>, vector<8x1xf32>
    %49 = vector.broadcast %48 : vector<8x1xf32> to vector<8x128xf32>
    %50 = arith.addf %47, %49 : vector<8x128xf32>
    %cst_43 = arith.constant 0.000000e+00 : f32
    %51 = vector.broadcast %cst_43 : f32 to vector<8x128xf32>
    %52 = arith.maximumf %50, %51 : vector<8x128xf32>
    %c0_44 = arith.constant 0 : index
    %c0_45 = arith.constant 0 : index
    %c0_46 = arith.constant 0 : index
    %53 = vector.load %arg6[%c0_44, %c0_45, %c0_46] : memref<1x8x128xf32, #tpu.memory_space<vmem>>, vector<1x8x128xf32>
    %54 = vector.shape_cast %53 : vector<1x8x128xf32> to vector<8x128xf32>
    %55 = vector.shape_cast %52 : vector<8x128xf32> to vector<1x8x128xf32>
    tpu.vector_store %arg6[%c0_44, %c0_45, %c0_46], %55 {strides = array<i32>} : memref<1x8x128xf32, #tpu.memory_space<vmem>>, vector<1x8x128xf32>,
    return
  }
  func.func @transform_0(%arg0: i32, %arg1: i32) -> (i32, i32, i32, i32) {
    %c0_i32 = arith.constant 0 : i32
    %c0_i32_0 = arith.constant 0 : i32
    %c0_i32_1 = arith.constant 0 : i32
    return %arg0, %arg1, %c0_i32, %c0_i32_0 : i32, i32, i32, i32
  }
  func.func @transform_1(%arg0: i32, %arg1: i32) -> (i32, i32) {
    %c0_i32 = arith.constant 0 : i32
    %c0_i32_0 = arith.constant 0 : i32
    %c0_i32_1 = arith.constant 0 : i32
    return %c0_i32, %c0_i32_0 : i32, i32
  }
  func.func @transform_2(%arg0: i32, %arg1: i32) -> (i32, i32) {
    %c0_i32 = arith.constant 0 : i32
    %c0_i32_0 = arith.constant 0 : i32
    %c0_i32_1 = arith.constant 0 : i32
    return %c0_i32, %c0_i32_0 : i32, i32
  }
  func.func @transform_3(%arg0: i32, %arg1: i32) -> (i32, i32) {
    %c0_i32 = arith.constant 0 : i32
    %c0_i32_0 = arith.constant 0 : i32
    return %c0_i32, %arg1 : i32, i32
  }
  func.func @transform_4(%arg0: i32, %arg1: i32) -> (i32, i32, i32) {
    %c0_i32 = arith.constant 0 : i32
    %c0_i32_0 = arith.constant 0 : i32
    return %arg0, %c0_i32, %arg1 : i32, i32, i32
  }
}

</mosaic_0001>

<bundles_post_ra>
// kernel: tpu_custom_call.1
= control target key start
LH: loop header
LB: loop body
LE: loop exit
PB: predicated region body
PF: predicated region fallthrough
CT: control target
= control target key end

     0   :  { %9 = vsyncpa [#allocation3], 0  ;;  %s1479_s0 = inlined_call_operand.hbm [shape: f32[2,2,4,162], index: 0, kind: input, shape index: {}]   ;;  %s1480_s1 = inlined_call_operand.vmem [shape: f32[8,36], index: 1, kind: input, shape index: {}]   ;;  %s1481_s2 = inlined_call_operand.vmem [shape: f32[8,1], index: 2, kind: input, shape index: {}]   ;;  %s1482_s3 = inlined_call_operand.hbm [shape: f32[9,256], index: 3, kind: input, shape index: {}]   ;;  %s1483_s4 = inlined_call_operand.hbm [shape: f32[2,8,256], index: 4, kind: output, shape index: {}]  }
   0x1   :  { %11 = vsyncpa [#allocation3 + $0x1], 0 }
   0x2   :  { %12 = vsyncpa [#allocation6], 0 }
   0x3   :  { %14 = vsyncpa [#allocation6 + $0x1], 0 }
   0x4   :  { %15 = vsyncpa [#allocation4], 0 }
   0x5   :  { %17 = vsyncpa [#allocation4 + $0x1], 0  ;;  %s1130_s15 = smov 0   ;;  %s1132_s16 = smov 0  }
   0x6   :  { %s1134_s17 = smov 0   ;;  %s1136_s18 = smov 0  }
   0x7   :  { %s1138_s19 = smov 0   ;;  %s1140_s20 = smov 0  }
   0x8   :  { %s1142_s21 = smov 0   ;;  %s1144_s22 = smov 0  }
   0x9   :  { %s1146_s23 = smov 0   ;;  %s1148_s24 = smov 0  }
   0xa   :  { %s1150_s25 = smov 0  }
   0xb LB: > { %1491 = sst [smem:[#allocation11_spill]] %s1049_s18  ;;  %s669_s26 = sadd.s32 4294967295, %s1077_s25   ;;  %s1077_s25 = sphi %s1150_s25, %s23_s25   ;;  %s1073_s24 = sphi %s1148_s24, %s1526_s24   ;;  %s1069_s23 = sphi %s1146_s23, %s1525_s23   ;;  %s1065_s22 = sphi %s1144_s22, %s1524_s22   ;;  %s1061_s21 = sphi %s1142_s21, %s1523_s21   ;;  %s1057_s20 = sphi %s1140_s20, %s1515_s20   ;;  %s1053_s19 = sphi %s1138_s19, %s1522_s19   ;;  %s1049_s18 = sphi %s1136_s18, %s1521_s18   ;;  %s1045_s17 = sphi %s1134_s17, %s1520_s17   ;;  %s1041_s16 = sphi %s1132_s16, %s1519_s16   ;;  %s1037_s15 = sphi %s1130_s15, %s1518_s15  }
   0xc   : > { %1492 = sst [smem:[#allocation12_spill]] %s1057_s20  ;;  %s670_s27 = sadd.s32 4294967294, %s1077_s25  }
   0xd   : > { %s32_s28 = sadd.s32 1, %s1069_s23  ;;  %s35_s29 = sadd.s32 1, %s1073_s24 }
   0xe   : > { %p33_p0 = scmp.ge.s32.totalorder %s32_s28, 2  ;;  %s44_s30 = sadd.s32 1, %s1057_s20 }
   0xf   : > { %p51_p1 = scmp.ne.s32.totalorder %s1057_s20, %s1053_s19  ;;  %p52_p2 = scmp.eq.s32.totalorder %s1077_s25, 0 }
  0x10   : > { %s1528_s28 = smov (%p33_p0, %s32_s28), 0  ;;  %s1530_s29 = smov (!%p33_p0, %s35_s29), %s1073_s24 }
  0x11   : > { %1493 = sst [smem:[#allocation13_spill]] %s1528_s28  ;;  %s40_s5 = ssub.s32 %s1069_s23, %s1528_s28 }
  0x12   : > { %p1203_p3 = por %p52_p2, %p51_p1  ;;  %p37_p4 = scmp.ge.s32.totalorder %s1530_s29, 2 }
  0x13   : > { %p57_p5 = scmp.ne.s32.totalorder %s1053_s19, %s1049_s18  ;;  %p1209_p6 = scmp.eq.s32.totalorder %s669_s26, 0 }
  0x14   : > { %p110_p7 = scmp.eq.s32.totalorder %s40_s5, 0  ;;  %s1532_s29 = smov (%p37_p4, %s1530_s29), 0 }
  0x15   : > { %1496 = sst [smem:[#allocation14_spill]] %s1532_s29  ;;  %p1220_p8 = por %p1209_p6, %p57_p5 }
  0x16   : > { %s112_s9 = sadd.s32 1, %s1045_s17  ;;  %s39_s10 = ssub.s32 %s1073_s24, %s1532_s29 }
  0x17   : > { %s1497_s8 = scalar_select %p1220_p8, 1, 0 }
  0x18   : > { %p119_p9 = scmp.ne.s32.totalorder %s1045_s17, %s1041_s16  ;;  %s41_s11 = sor.u32 %s40_s5, %s39_s10 }
  0x19   : > { %p125_p10 = scmp.ne.s32.totalorder %s1041_s16, %s1037_s15  ;;  %p42_p11 = scmp.eq.s32.totalorder %s41_s11, 0 }
  0x1a   : > { %p1233_p12 = por %p119_p9, %p52_p2  ;;  %p151_p0 = scmp.eq.s32.totalorder %s669_s26, 3 }
  0x1b   : > { %s1238_s13 = scalar_select %p110_p7, %s1045_s17, %s112_s9  }
  0x1c   : > { %s1241_s14 = scalar_select %p42_p11, %s1057_s20, %s44_s30  }
  0x1d   : > { %1499 = sst [smem:[#allocation15_spill]] %s1238_s13  ;;  %p1245_p13 = por %p125_p10, %p1209_p6 }
  0x1e   : > { %1500 = sst [smem:[#allocation16_spill]] %s1241_s14  ;;  %p157_p4 = scmp.eq.s32.totalorder %s670_s27, 3 }
  0x1f   : > { %s1501_s29 = scalar_select %p1245_p13, 1, 0 }
  0x20   : > { %p1252_p2 = por %p151_p0, %p51_p1  ;;  %p741_p7 = scmp.lt.s32.totalorder %s1077_s25, 4 }
  0x21   : > { %p1260_p9 = por %p157_p4, %p57_p5  ;;  %s183_s5 = sand.u32 1, %s1057_s20  }
  0x22   : > { %s1502_s15 = scalar_select %p1252_p2, 1, 0 }
  0x23   : > { %s1503_s30 = scalar_select %p1260_p9, 1, 0 }
  0x24   : > { %s673_s7 = sshll.u32 %s183_s5, 3  ;;  %s674_s9 = sshll.u32 %s1069_s23, 1 }
  0x25   : > { %s675_s10 = sshll.u32 %s1073_s24, 2  ;;  %s187_s26 = scalar_lea.vmem [#allocation2], %s673_s7 }
  0x26   : > { %s197_s11 = sshll.u32 %s187_s26, 4  ;;  %s193_s28 = sadd.s32 %s675_s10, %s674_s9  ;;  %s1267_s11 = int_to_ptr.vmem [resolvable:$true] %s197_s11 }
  0x27   : > { %s676_s27 = sshll.u32 %s193_s28, 6  ;;  %p1273_p1 = pnand %p741_p7, %p1203_p3 }
  0x28   : > { %s1280_s20 = scalar_lea.hbm %s1479_s0, %s676_s27  ;;  %p1286_p5 = pnand %p741_p7, %p1233_p12 }
  0x29   : > { %s184_s6 = scalar_lea.sflag [#allocation3], %s183_s5  ;;  %s891_s7 = scalar_lea.hbm %s1280_s20, 128 }
  0x2a   : > { %p892_p6 = scmp.ne.s32.totalorder %s1280_s20, %s891_s7  ;;  %p893_p10 = pneg %p1273_p1 }
  0x2b   : > { %s896_s13 = scalar_lea.hbm %s1479_s0, 512  ;;  %p897_p12 = scmp.lt.u32.totalorder %s1280_s20, %s1479_s0 }
  0x2c   : > { %p894_p11 = pnand %p893_p10, %p892_p6  ;;  %p898_p4 = scmp.lt.u32.totalorder %s896_s13, %s891_s7 }
  0x2d   : > { %p900_p3 = scmp.lt.u32.totalorder %s891_s7, %s1280_s20 }
  0x2e   : > { %p895_p0 = pneg %p894_p11  ;;  %p899_p7 = por %p898_p4, %p897_p12 }
  0x30   : > { %p901_p9 = por %p900_p3, %p899_p7 }
  0x32   : > { %p902_p2 = pnand %p901_p9, %p895_p0 }
  0x34   : > { %905 = shalt.err (!%p902_p2)
}
  0x35   : > { %s906_s5 = scalar_lea.vmem %s1267_s11, 128  ;;  %s1079_s26 = smov [#allocation2]  }
  0x36   : > { %p907_p6 = scmp.ne.s32.totalorder %s1267_s11, %s906_s5  ;;  %s911_s27 = sshll.u32 %s1079_s26, 4  ;;  %s912_s27 = int_to_ptr.vmem [resolvable:$false] %s911_s27 }
  0x37   : > { %s913_s18 = scalar_lea.vmem %s912_s27, 256  ;;  %p914_p8 = scmp.lt.s32.totalorder %s1267_s11, %s912_s27 }
  0x38   : > { %p909_p11 = pnand %p907_p6, %p893_p10  ;;  %p915_p12 = scmp.lt.s32.totalorder %s913_s18, %s906_s5 }
  0x3a   : > { %p910_p13 = pneg %p909_p11  ;;  %p916_p4 = por %p915_p12, %p914_p8 }
  0x3c   : > { %p917_p3 = pnand %p916_p4, %p910_p13 }
  0x3e   : > { %920 = shalt.err (!%p917_p3)
}
  0x3f   : > { %733 = dma.hbm_to_vmem [thread:$0]  (!%p1273_p1), %s1280_s20, 128, %s1267_s11, %s184_s6  }
  0x40   : > { %p222_p2 = scmp.lt.s32.totalorder %s1077_s25, 5  ;;  %s204_s7 = sand.u32 1, %s1045_s17  }
  0x41   : > { %s678_s12 = sshll.u32 %s1069_s23, 7  ;;  %p1506_p9 = scmp.ge.s32.totalorder %s1077_s25, 1 }
  0x42   : > { %s677_s9 = sshll.u32 %s204_s7, 4  ;;  %s1328_s5 = scalar_lea.hbm %s1482_s3, %s678_s12 }
  0x43   : > { %p1321_p10 = pnand %p1506_p9, %p222_p2  ;;  %s208_s26 = scalar_lea.vmem [#allocation5], %s677_s9 }
  0x44   : > { %s214_s20 = sshll.u32 %s208_s26, 4  ;;  %s1332_s11 = scalar_lea.sflag [#allocation6], %s204_s7  ;;  %s1330_s20 = int_to_ptr.vmem [resolvable:$true] %s214_s20 }
  0x45   : > { %s921_s6 = scalar_lea.hbm %s1328_s5, 256  ;;  %p923_p13 = pneg %p1286_p5 }
  0x46   : > { %p922_p8 = scmp.ne.s32.totalorder %s1328_s5, %s921_s6  ;;  %s926_s12 = scalar_lea.hbm %s1482_s3, 512 }
  0x47   : > { %p927_p7 = scmp.lt.u32.totalorder %s1328_s5, %s1482_s3  ;;  %p928_p6 = scmp.lt.u32.totalorder %s926_s12, %s921_s6 }
  0x48   : > { %p924_p1 = pnand %p923_p13, %p922_p8  ;;  %p930_p12 = scmp.lt.u32.totalorder %s921_s6, %s1328_s5 }
  0x49   : > { %p929_p11 = por %p928_p6, %p927_p7 }
  0x4a   : > { %p925_p0 = pneg %p924_p1 }
  0x4b   : > { %p931_p4 = por %p930_p12, %p929_p11 }
  0x4d   : > { %p932_p3 = pnand %p931_p4, %p925_p0 }
  0x4f   : > { %935 = shalt.err (!%p932_p3)
}
  0x50   : > { %s936_s7 = scalar_lea.vmem %s1330_s20, 256  ;;  %s1080_s9 = smov [#allocation5]  }
  0x51   : > { %p937_p2 = scmp.ne.s32.totalorder %s1330_s20, %s936_s7  ;;  %s941_s26 = sshll.u32 %s1080_s9, 4  ;;  %s942_s26 = int_to_ptr.vmem [resolvable:$false] %s941_s26 }
  0x52   : > { %s943_s27 = scalar_lea.vmem %s942_s26, 512  ;;  %p944_p1 = scmp.lt.s32.totalorder %s1330_s20, %s942_s26 }
  0x53   : > { %p939_p9 = pnand %p937_p2, %p923_p13  ;;  %p945_p7 = scmp.lt.s32.totalorder %s943_s27, %s936_s7 }
  0x55   : > { %p940_p8 = pneg %p939_p9  ;;  %p946_p6 = por %p945_p7, %p944_p1 }
  0x57   : > { %p947_p11 = pnand %p946_p6, %p940_p8 }
  0x59   : > { %950 = shalt.err (!%p947_p11)
}
  0x5a   : > { %s1081_s6 = smov 256   ;;  %s1082_s18 = smov 128  }
  0x5b   : > { %s1083_s12 = smov 8   ;;  %226 = sbr.rel (%p1321_p10) target bundleno = 597 (0x255), region = 36 }
  0x5c   : > { %736 = dma.hbm_to_vmem [thread:$0]  (!%p1286_p5), %s1328_s5, 256, %s1330_s20, %s1332_s11, %s1081_s6, %s1082_s18, %s1083_s12  }
  0x5d   : > { %s1363_s10 = sand.u32 (!%p1321_p10), 1, %s1053_s19   ;;  %p1508_p13 = scmp.ne.s32.totalorder (!%p1321_p10), %s1497_s8, 0 }
  0x5e   : > { %s680_s14 = sshll.u32 (!%p1321_p10), %s1363_s10, 3  ;;  %s229_s7 = scalar_lea.sflag (!%p1321_p10), [#allocation3], %s1363_s10 }
  0x5f   : > { %s1369_s9 = scalar_lea.vmem (!%p1321_p10), [#allocation2], %s680_s14 }
  0x62   : > { %1024 = dma.done.wait (%p1508_p13), %s229_s7, 128  }
  0x63   : > { %1026 = vsyncadd (%p1508_p13), %s229_s7, 4294967168  ;;  %s237_s28 = sand.u32 1, %s1041_s16   ;;  %p1509_p5 = scmp.ne.s32.totalorder %s1501_s29, 0 }
  0x64   : > { %s681_s13 = sshll.u32 %s237_s28, 4  ;;  %s238_s5 = scalar_lea.sflag [#allocation6], %s237_s28 }
  0x65   : > { %s1376_s20 = scalar_lea.vmem [#allocation5], %s681_s13 }
  0x66   : > { %1028 = dma.done.wait (%p1509_p5), %s238_s5, 256  }
  0x67   : > { %1030 = vsyncadd (%p1509_p5), %s238_s5, 4294967040  ;;  %v686_v0 = vld [vmem:[%s1376_s20 + $0x3] ss:$0 sm:$0xff]  ;;  %v684_v1 = vld [vmem:[%s1376_s20 + $0x1] ss:$0 sm:$0xff]  ;;  %s1084_s8 = smov 16  }
  0x68   : > { %311 = vrot.lane.b32.xlu1 %v686_v0, %s1084_s8  ;;  %s1085_s11 = smov 1   ;;  %v687_v2 = vld [vmem:[%s1376_s20 + $0x4] ss:$0 sm:$0xff]  ;;  %v685_v3 = vld [vmem:[%s1376_s20 + $0x2] ss:$0 sm:$0xff]  ;;  %s1086_s26 = smov 17  }
  0x69   : > { %285 = vrot.lane.b32.xlu0 %v684_v1, %s1085_s11  ;;  %s1087_s29 = smov 2   ;;  %v689_v4 = vld [vmem:[%s1376_s20 + $0x6] ss:$0 sm:$0xff]  ;;  %v688_v5 = vld [vmem:[%s1376_s20 + $0x5] ss:$0 sm:$0xff]  ;;  %s1088_s27 = smov 32  }
  0x6a   : > { %s1089_s6 = smov 18   ;;  %v690_v6 = vld [vmem:[%s1376_s20 + $0x7] ss:$0 sm:$0xff]  ;;  %v691_v7 = vld [vmem:[%s1376_s20 + $0x8] ss:$0 sm:$0xff]  ;;  %s1090_s18 = smov 33  }
  0x6b   : > { %s1091_s12 = smov 34   ;;  %vm314_vm0 = vcmask 130048   ;;  %vm288_vm1 = vcmask 7168   ;;  %v278_v10 = vld [vmem:[%s1369_s9] sm:$0xff]  ;;  %vm327_vm2 = vcmask 138240   ;;  %vm301_vm3 = vcmask 15360  }
  0x6c   : > { %324 = vrot.lane.b32.xlu1 %v687_v2, %s1086_s26  ;;  %v1092_v22 = vmov 0.0|0.0   ;;  %vm353_vm4 = vcmask 261120   ;;  %vm340_vm5 = vcmask 146432   ;;  %s1093_s7 = smov 127   ;;  %vm366_vm6 = vcmask 269312   ;;  %s1094_s28 = smov 126  }
  0x6d   : > { %298 = vrot.lane.b32.xlu0 %v685_v3, %s1087_s29  ;;  %718 = vmatprep.subr.bf16.mxu0 %v1092_v22  ;;  %vm379_vm7 = vcmask 277504   ;;  %s1095_s13 = smov 112   ;;  %s1096_s5 = smov 111   ;;  %vm1098_vm8 = vmmov 0   ;;  %v1099_v56 = vmov 0.0   ;;  %v1100_v57 = vmov 0  }
  0x6e   : > { %s1097_s8 = smov 110   ;;  %715 = vmatprep.mubr.msk.f32.mxu0 %vm1098_vm8, %v1099_v56  ;;  %889 = vset.pattern.permute.xlu1 %v1100_v57  ;;  %s1101_s11 = smov 96   ;;  %v460_v59 = vld [vmem:[%s1481_s2] sm:$0xff]  ;;  %vm389_vm9 = vcmask 1039360   ;;  %vm398_vm10 = vcmask 1031168   ;;  %vm407_vm11 = vcmask 916480  }
  0x6f   : > { %890 = vset.pattern.permute.xlu0 %v1100_v57  ;;  %s1102_s26 = smov 95   ;;  %s1103_s29 = smov 94   ;;  %v271_v61 = vld [vmem:[%s1369_s9] sm:$0xf]  ;;  %v683_v62 = vld [vmem:[%s1376_s20] ss:$0 sm:$0xff] }
  0x70   : > { %350 = vrot.lane.b32.xlu1 %v689_v4, %s1088_s27  ;;  %v277_v1 = vmul.f32 %v683_v62, %v271_v61  ;;  %vm454_vm12 = vcmask 1043456   ;;  %vm416_vm13 = vcmask 908288   ;;  %vm425_vm14 = vcmask 900096   ;;  %p1510_p0 = scmp.ne.s32.totalorder %s1502_s15, 0 }
  0x71   : > { %337 = vrot.lane.b32.xlu0 %v688_v5, %s1089_s6  ;;  %vm434_vm15 = vcmask 785408  }
  0x74   : > { %376 = vrot.lane.b32.xlu1 %v691_v7, %s1091_s12 }
  0x75   : > { %363 = vrot.lane.b32.xlu0 %v690_v6, %s1090_s18  ;;  %s695_s18 = sshll.u32 %s1065_s22, 1 }
  0x76   : > { %s556_s12 = sadd.s32 %s1061_s21, %s695_s18  ;;  %s545_s21 = scalar_lea.sflag [#allocation4], %s1363_s10 }
  0xda   : > { %v312_v8 = vpop.permute.xlu1 %311 }
  0xdb   : > { %v286_v9 = vpop.permute.xlu0 %285  ;;  %v313_v11 = vrot.slane %v312_v8, 4 }
  0xdc   : > { %v287_v12 = vrot.slane %v286_v9, 4 }
  0xdd   : > { %v315_v13 = vsel %vm314_vm0, %v313_v11, %v312_v8  ;;  %vm443_vm0 = vcmask 777216  }
  0xde   : > { %v289_v14 = vsel %vm288_vm1, %v287_v12, %v286_v9  ;;  %v317_v15 = vmul.f32 %v315_v13, %v278_v10  ;;  %v325_v17 = vpop.permute.xlu1 %324  ;;  %vm452_vm1 = vcmask 769024  }
  0xdf   : > { %v291_v16 = vmul.f32 %v289_v14, %v278_v10  ;;  %v299_v18 = vpop.permute.xlu0 %298  ;;  %v326_v19 = vrot.slane %v325_v17, 4 }
  0xe0   : > { %v300_v20 = vrot.slane %v299_v18, 4  ;;  %v402_v23 = vcombine.low %v317_v15, %v317_v15 }
  0xe1   : > { %v384_v21 = vcombine.low %v291_v16, %v291_v16  ;;  %v328_v24 = vsel %vm327_vm2, %v326_v19, %v325_v17  ;;  %vm466_vm2 = vcmask 293888  }
  0xe2   : > { %v302_v25 = vsel %vm301_vm3, %v300_v20, %v299_v18  ;;  %v330_v26 = vmul.f32 %v328_v24, %v278_v10  ;;  %v351_v28 = vpop.permute.xlu1 %350  ;;  %v864_v36 = vpack.i.bf16 %v317_v15, %v402_v23 }
  0xe3   : > { %v304_v27 = vmul.f32 %v302_v25, %v278_v10  ;;  %v338_v29 = vpop.permute.xlu0 %337  ;;  %v854_v30 = vpack.i.bf16 %v291_v16, %v384_v21  ;;  %v352_v31 = vrot.slane %v351_v28, 4 }
  0xe4   : > { %v339_v32 = vrot.slane %v338_v29, 4  ;;  %v411_v37 = vcombine.high %v330_v26, %v330_v26 }
  0xe5   : > { %v393_v33 = vcombine.high %v304_v27, %v304_v27  ;;  %855 = vrot.lane.b32.xlu0 %v854_v30, %s1093_s7  ;;  %v354_v34 = vsel %vm353_vm4, %v352_v31, %v351_v28  ;;  %s696_s7 = sshll.u32 %s556_s12, 7 }
  0xe6   : > { %v341_v35 = vsel %vm340_vm5, %v339_v32, %v338_v29  ;;  %v356_v38 = vmul.f32 %v354_v34, %v278_v10  ;;  %v377_v42 = vpop.permute.xlu1 %376  ;;  %v869_v50 = vpack.i.bf16 %v411_v37, %v330_v26 }
  0xe7   : > { %v343_v39 = vmul.f32 %v341_v35, %v278_v10  ;;  %v364_v40 = vpop.permute.xlu0 %363  ;;  %v859_v41 = vpack.i.bf16 %v393_v33, %v304_v27  ;;  %v378_v44 = vrot.slane %v377_v42, 4 }
  0xe8   : > { %v365_v43 = vrot.slane %v364_v40, 4  ;;  %v429_v48 = vcombine.high %v356_v38, %v356_v38 }
  0xe9   : > { %v420_v45 = vcombine.low %v343_v39, %v343_v39  ;;  %860 = vrot.lane.b32.xlu1 %v859_v41, %s1094_s28  ;;  %865 = vrot.lane.b32.xlu0 %v864_v36, %s1095_s13  ;;  %v380_v47 = vsel %vm379_vm7, %v378_v44, %v377_v42  ;;  %s270_s28 = scalar_lea.vmem [#allocation7], %s680_s14  ;;  %s1104_s14 = smov [#allocation7]  }
  0xea   : > { %v367_v46 = vsel %vm366_vm6, %v365_v43, %v364_v40  ;;  %v382_v53 = vmul.f32 %v380_v47, %v278_v10  ;;  %v879_v54 = vpack.i.bf16 %v429_v48, %v356_v38  ;;  %s560_s13 = sshll.u32 %s270_s28, 4  ;;  %s1418_s13 = int_to_ptr.vmem [resolvable:$true] %s560_s13 }
  0xeb   : > { %v369_v49 = vmul.f32 %v367_v46, %v278_v10  ;;  %v874_v51 = vpack.i.bf16 %v343_v39, %v420_v45  ;;  %s951_s22 = scalar_lea.vmem %s1418_s13, 128 }
  0xec   : > { %v447_v58 = vcombine.high %v382_v53, %v382_v53  ;;  %p952_p10 = scmp.ne.s32.totalorder %s1418_s13, %s951_s22 }
  0xed   : > { %v438_v52 = vcombine.low %v369_v49, %v369_v49  ;;  %870 = vrot.lane.b32.xlu1 %v869_v50, %s1096_s5  ;;  %875 = vrot.lane.b32.xlu0 %v874_v51, %s1097_s8 }
  0xee   : > { %p953_p12 = pnand %p952_p10, %p1510_p0 }
  0xef   : > { %v884_v55 = vpack.i.bf16 %v369_v49, %v438_v52 }
  0xf0   : > { %p954_p4 = pneg %p953_p12 }
  0xf1   : > { %880 = vrot.lane.b32.xlu1 %v879_v54, %s1101_s11  ;;  %885 = vrot.lane.b32.xlu0 %v884_v55, %s1102_s26  ;;  %s1416_s11 = scalar_lea.hbm %s1483_s4, %s696_s7  ;;  %s955_s26 = sshll.u32 %s1104_s14, 4  ;;  %s956_s26 = int_to_ptr.vmem [resolvable:$false] %s955_s26 }
  0xf2   : > { %p958_p3 = scmp.lt.s32.totalorder %s1418_s13, %s956_s26 }
  0xf5   : > { %448 = vrot.lane.b32.xlu1 %v382_v53, %s1103_s29  ;;  %450 = vrot.lane.b32.xlu0 %v447_v58, %s1103_s29  ;;  %s957_s29 = scalar_lea.vmem %s956_s26, 256 }
  0xf6   : > { %p959_p2 = scmp.lt.s32.totalorder %s957_s29, %s951_s22 }
  0xf8   : > { %p960_p9 = por %p959_p2, %p958_p3 }
  0xf9   : > { %463 = vperm.xlu1 %889, %v460_v59  }
  0xfa   : > { %p961_p8 = pnand %p960_p9, %p954_p4 }
 0x157   : > { %v856_v60 = vpop.permute.xlu0 %855 }
 0x158   : > { %v858_v63 = vunpack.i.h.bf16 %v856_v60  ;;  %v857_v0 = vunpack.i.l.bf16 %v856_v60 }
 0x15a   : > { %v390_v4 = vsel %vm389_vm9, %v857_v0, %v858_v63 }
 0x15b   : > { %v861_v2 = vpop.permute.xlu1 %860  ;;  %v866_v3 = vpop.permute.xlu0 %865  ;;  %v455_v13 = vsel %vm454_vm12, %v277_v1, %v390_v4 }
 0x15c   : > { %v863_v5 = vunpack.i.h.bf16 %v861_v2  ;;  %v862_v6 = vunpack.i.l.bf16 %v861_v2  ;;  %v868_v7 = vunpack.i.h.bf16 %v866_v3  ;;  %v867_v8 = vunpack.i.l.bf16 %v866_v3 }
 0x15e   : > { %v399_v9 = vsel %vm398_vm10, %v862_v6, %v863_v5  ;;  %v408_v10 = vsel %vm407_vm11, %v867_v8, %v868_v7 }
 0x15f   : > { %v871_v11 = vpop.permute.xlu1 %870  ;;  %v876_v12 = vpop.permute.xlu0 %875  ;;  %v456_v14 = vsel %vm454_vm12, %v399_v9, %v408_v10 }
 0x160   : > { %v873_v15 = vunpack.i.h.bf16 %v871_v11  ;;  %v872_v16 = vunpack.i.l.bf16 %v871_v11  ;;  %v878_v17 = vunpack.i.h.bf16 %v876_v12  ;;  %v877_v18 = vunpack.i.l.bf16 %v876_v12 }
 0x161   : > { %v719_v19 = vpack.c.bf16 %v456_v14, %v455_v13 }
 0x162   : > { %v417_v20 = vsel %vm416_vm13, %v872_v16, %v873_v15  ;;  %v426_v21 = vsel %vm425_vm14, %v877_v18, %v878_v17 }
 0x163   : > { %720 = vmatpush3.bf16.msra.mxu0 %v719_v19  ;;  %v881_v23 = vpop.permute.xlu1 %880  ;;  %v886_v24 = vpop.permute.xlu0 %885  ;;  %v457_v31 = vsel %vm454_vm12, %v417_v20, %v426_v21 }
 0x164   : > { %v883_v25 = vunpack.i.h.bf16 %v881_v23  ;;  %v882_v26 = vunpack.i.l.bf16 %v881_v23  ;;  %v888_v27 = vunpack.i.h.bf16 %v886_v24  ;;  %v887_v28 = vunpack.i.l.bf16 %v886_v24  ;;  %721 = vmatprep.subr.bf16.mxu0 %v1092_v22  ;;  %v459_v22 = vld [vmem:[%s1480_s1] sm:$0xff] }
 0x166   : > { %v435_v29 = vsel %vm434_vm15, %v882_v26, %v883_v25  ;;  %v444_v30 = vsel %vm443_vm0, %v887_v28, %v888_v27 }
 0x167   : > { %v458_v32 = vsel %vm454_vm12, %v435_v29, %v444_v30  ;;  %v449_v34 = vpop.permute.xlu1 %448  ;;  %v451_v35 = vpop.permute.xlu0 %450 }
 0x168   : > { %v722_v33 = vpack.c.bf16 %v458_v32, %v457_v31  ;;  %v453_v36 = vsel %vm452_vm1, %v449_v34, %v451_v35 }
 0x16a   : > { %723 = vmatpush3.bf16.msra.mxu0 %v722_v33 }
 0x16b   : > { %713 = vmatprep.subr.mxu0 %v1099_v56 }
 0x16e   : > { %714 = vmatpush3.msk.msra.mxu0 %vm454_vm12, %v453_v36 }
 0x16f   : > { %716 = vmatmul.mubr.msk.f32.vlgmr.msra.gmra.mrb[0].mxu0 %vm466_vm2, %v459_v22 }
 0x178   : > { %v464_v37 = vpop.permute.xlu1 %463 }
 0x242   : > { %v538_v38 = vpop.f32.mrb[0].mxu0 }
 0x243   : > { %v539_v39 = vadd.f32 %v538_v38, %v464_v37  ;;  %v717_v40 = vpop.f32.mrb[1].mxu0 }
 0x245   : > { %v542_v41 = vmax.f32 %v539_v39, 0.0 }
 0x247   : > { %543 = vst [vmem:[%s270_s28] sm:$0xff] %v542_v41 }
 0x248   : > { %964 = shalt.err (!%p961_p8)
}
 0x249   : > { %s965_s10 = scalar_lea.hbm %s1416_s11, 128  ;;  %s969_s9 = scalar_lea.hbm %s1483_s4, 512 }
 0x24a   : > { %p966_p1 = scmp.ne.s32.totalorder %s1416_s11, %s965_s10  ;;  %p970_p11 = scmp.lt.u32.totalorder %s1416_s11, %s1483_s4 }
 0x24b   : > { %p971_p13 = scmp.lt.u32.totalorder %s969_s9, %s965_s10  ;;  %p973_p10 = scmp.lt.u32.totalorder %s965_s10, %s1416_s11 }
 0x24c   : > { %p967_p7 = pnand %p966_p1, %p1510_p0 }
 0x24d   : > { %p972_p5 = por %p971_p13, %p970_p11 }
 0x24e   : > { %p968_p6 = pneg %p967_p7 }
 0x24f   : > { %p974_p12 = por %p973_p10, %p972_p5 }
 0x251   : > { %p975_p4 = pnand %p974_p12, %p968_p6 }
 0x253   : > { %978 = shalt.err (!%p975_p4)
}
 0x254   : > { %728 = dma.vmem_to_hbm [thread:$0]  (%p1510_p0), %s1418_s13, 128, %s1416_s11, %s545_s21  }
 0x255 PF: > { %s1511_s12 = sld [smem:[#allocation11_spill]]  ;;  %p742_p3 = scmp.ge.s32.totalorder %s1077_s25, 2 }
 0x256   : > { %p1512_p2 = scmp.ne.s32.totalorder %s1503_s30, 0 }
 0x258   : > { %p738_p9 = pnand %p742_p3, %p1512_p2 }
 0x25b   : > { %s572_s7 = sand.u32 1, %s1511_s12  }
 0x25c   : > { %s573_s28 = scalar_lea.sflag [#allocation4], %s572_s7 }
 0x25d   : > { %1032 = dma.done.wait (!%p738_p9), %s573_s28, 128  }
 0x25e   : > { %1034 = vsyncadd (!%p738_p9), %s573_s28, 4294967168  ;;  %s23_s25 = sadd.s32 1, %s1077_s25   ;;  %s1513_s5 = sld [smem:[#allocation15_spill]] }
 0x25f   : > { %p20_p8 = scmp.ge.s32.totalorder %s23_s25, 6   ;;  %s1514_s8 = sld [smem:[#allocation12_spill]] }
 0x260   : > { %s1515_s20 = sld [smem:[#allocation16_spill]]  ;;  %s1516_s13 = sld [smem:[#allocation13_spill]] }
 0x261   : > { %s1517_s11 = sld [smem:[#allocation14_spill]]  ;;  %s1518_s15 = smov %s1041_s16 }
 0x262   : > { %s1519_s16 = smov %s1045_s17  ;;  %s1521_s18 = smov %s1053_s19 }
 0x263   : > { %s1523_s21 = smov %s1069_s23  ;;  %s1524_s22 = smov %s1073_s24 }
 0x264   : > { %s1520_s17 = smov %s1513_s5  ;;  %22 = sbr.rel (!%p20_p8) target bundleno = 11 (0xb), region = 94 }
 0x265   : > { %s1522_s19 = smov %s1514_s8 }
 0x266   : > { %s1525_s23 = smov %s1516_s13 }
 0x267   : > { %s1526_s24 = smov %s1517_s11 }
 0x26b   :  { %578 = vsyncpa [#allocation3], 1 }
 0x26c   :  { %580 = vsyncpa [#allocation3 + $0x1], 1 }
 0x26d   :  { %581 = vsyncpa [#allocation6], 1 }
 0x26e   :  { %583 = vsyncpa [#allocation6 + $0x1], 1 }
 0x26f   :  { %584 = vsyncpa [#allocation4], 1 }
 0x270   :  { %586 = vsyncpa [#allocation4 + $0x1], 1 }

</bundles_post_ra>
